<compile_context>
chip_gen: v7x
topology: tpu7x:2x2x1
jax: 0.10.0
libtpu: 0.0.40
codegen_flags: <defaults>
</compile_context>

<pallas_src>
import functools

import jax
import jax.numpy as jnp
from jax.experimental import pallas as pl
from jax.experimental.pallas import tpu as pltpu

STATE_DIM = 4      # CartPole-v1 observation_space.shape[0]
ACTION_DIM = 2     # CartPole-v1 action_space.n
HIDDEN_DIM = 16    # Actor default hidden_dim

_LANE = 128


def _round_up(x, m):
    return ((x + m - 1) // m) * m


def actor_kernel(s_ref, w1_ref, b1_ref, w2_ref, b2_ref, out_ref):
    # s_ref:  [STATE_DIM, TB]              (batch on the lane axis)
    # w1_ref: [HIDDEN_DIM, STATE_DIM]      b1_ref: [HIDDEN_DIM, 1]
    # w2_ref: [ACTION_DIM, HIDDEN_DIM]     b2_ref: [ACTION_DIM, 1]
    # out_ref:[ACTION_DIM, TB]
    s_t = s_ref[...]                      # already f32; no redundant cast

    # Biases read once (hoisted; nothing re-broadcasts inside a loop).
    b1 = b1_ref[...]
    b2 = b2_ref[...]

    # hidden = relu(W1 @ s + b1)  -> [HIDDEN_DIM, TB]
    h = jnp.dot(w1_ref[...], s_t, preferred_element_type=jnp.float32) + b1
    h = jnp.maximum(h, 0.0)

    # logits = W2 @ h + b2        -> [ACTION_DIM, TB]
    logits = jnp.dot(w2_ref[...], h, preferred_element_type=jnp.float32) + b2

    # 2-way softmax == sigmoid of the logit difference (exact identity):
    #   p0 = 1 / (1 + exp(-(l0 - l1))),   p1 = 1 - p0
    d = logits[0:1, :] - logits[1:2, :]                     # [1, TB]
    p0 = pl.reciprocal(1.0 + jnp.exp(-d), approx=True)      # EUP exp + EUP recip
    out_ref[0:1, :] = p0.astype(out_ref.dtype)
    out_ref[1:2, :] = (1.0 - p0).astype(out_ref.dtype)


@functools.partial(jax.jit, static_argnames=("block_b",))
def actor_forward(s, w1, b1, w2, b2, *, block_b=2048):
    """s: [B, STATE_DIM] f32; w1: [H, STATE_DIM]; b1: [H, 1];
       w2: [A, H]; b2: [A, 1]  ->  probs: [B, A] f32."""
    B = s.shape[0]
    # Lane-aligned batch tile. In the lane=batch layout one grid step only
    # touches ~(STATE_DIM + ACTION_DIM) * TB * 4 bytes of streamed VMEM, so
    # even double-buffered this is tiny vs. v7x's 64 MiB (and the default
    # scoped VMEM limit).
    TB = min(block_b, _round_up(B, _LANE))
    Bp = _round_up(B, TB)

    # Layout plumbing in the wrapper: put batch on the lane (last) axis.
    s_t = jnp.pad(s.T, ((0, 0), (0, Bp - B)))               # [STATE_DIM, Bp]

    grid = (Bp // TB,)
    out_t = pl.pallas_call(
        actor_kernel,
        out_shape=jax.ShapeDtypeStruct((ACTION_DIM, Bp), jnp.float32),
        grid=grid,
        in_specs=[
            pl.BlockSpec((STATE_DIM, TB), lambda i: (0, i)),           # streamed
            pl.BlockSpec((HIDDEN_DIM, STATE_DIM), lambda i: (0, 0)),   # resident
            pl.BlockSpec((HIDDEN_DIM, 1), lambda i: (0, 0)),           # resident
            pl.BlockSpec((ACTION_DIM, HIDDEN_DIM), lambda i: (0, 0)),  # resident
            pl.BlockSpec((ACTION_DIM, 1), lambda i: (0, 0)),           # resident
        ],
        out_specs=pl.BlockSpec((ACTION_DIM, TB), lambda i: (0, i)),
        compiler_params=pltpu.CompilerParams(
            dimension_semantics=("parallel",),   # batch axis -> both TCs on v7x
        ),
    )(s_t, w1, b1, w2, b2)

    return out_t[:, :B].T                                    # [B, ACTION_DIM]


def init_params(key):
    """Deterministic init matching nn.Linear's U(-1/sqrt(fan_in), 1/sqrt(fan_in)).
    Weights in PyTorch layout [out_features, in_features]; biases [out, 1]."""
    k1, k2, k3, k4 = jax.random.split(key, 4)
    bound1 = 1.0 / jnp.sqrt(STATE_DIM)
    bound2 = 1.0 / jnp.sqrt(HIDDEN_DIM)
    w1 = jax.random.uniform(k1, (HIDDEN_DIM, STATE_DIM), jnp.float32, -bound1, bound1)
    b1 = jax.random.uniform(k2, (HIDDEN_DIM, 1), jnp.float32, -bound1, bound1)
    w2 = jax.random.uniform(k3, (ACTION_DIM, HIDDEN_DIM), jnp.float32, -bound2, bound2)
    b2 = jax.random.uniform(k4, (ACTION_DIM, 1), jnp.float32, -bound2, bound2)
    return w1, b1, w2, b2


def reference_forward(s, w1, b1, w2, b2):
    h = jnp.maximum(s @ w1.T + b1[:, 0], 0.0)
    logits = h @ w2.T + b2[:, 0]
    return jax.nn.softmax(logits, axis=-1)


if __name__ == "__main__":
    key = jax.random.PRNGKey(0)
    k_params, k_s = jax.random.split(key)

    w1, b1, w2, b2 = init_params(k_params)

    batch = 8
    s = jax.random.normal(k_s, (batch, STATE_DIM), jnp.float32)

    probs = actor_forward(s, w1, b1, w2, b2)
    probs = jax.block_until_ready(probs)

    ref = reference_forward(s, w1, b1, w2, b2)
    assert probs.shape == (batch, ACTION_DIM)
    # Approx EUP reciprocal/exp => slightly looser tolerance than exact divide.
    assert jnp.allclose(probs, ref, atol=1e-3, rtol=1e-3)
    assert jnp.allclose(jnp.sum(probs, axis=-1), 1.0, atol=1e-5)

    print("KERNEL_OK")
</pallas_src>

<mosaic_0001>
module attributes {stable_mosaic.version = 11 : i64} {
  func.func @actor_kernel(%arg0: i32, %arg1: memref<4x128xf32, #tpu.memory_space<vmem>>, %arg2: memref<16x4xf32, #tpu.memory_space<vmem>>, %arg3: memref<16x1xf32, #tpu.memory_space<vmem>>, %arg4: memref<2x16xf32, #tpu.memory_space<vmem>>, %arg5: memref<2x1xf32, #tpu.memory_space<vmem>>, %arg6: memref<2x128xf32, #tpu.memory_space<vmem>>) attributes {dimension_semantics = [#tpu.dimension_semantics<parallel>], iteration_bounds = array<i64: 1>, scalar_prefetch = 0 : i64, scratch_operands = 0 : i64, tpu.core_type = #tpu.core_type<tc>, window_params = [{transform_indices = @transform_0, window_bounds = array<i64: 4, 128>}, {pipeline_mode = #tpu.pipeline_mode<synchronous>, transform_indices = @transform_1, window_bounds = array<i64: 16, 4>}, {pipeline_mode = #tpu.pipeline_mode<synchronous>, transform_indices = @transform_2, window_bounds = array<i64: 16, 1>}, {pipeline_mode = #tpu.pipeline_mode<synchronous>, transform_indices = @transform_3, window_bounds = array<i64: 2, 16>}, {pipeline_mode = #tpu.pipeline_mode<synchronous>, transform_indices = @transform_4, window_bounds = array<i64: 2, 1>}, {transform_indices = @transform_5, window_bounds = array<i64: 2, 128>}]} {
    %c0 = arith.constant 0 : index
    %c0_0 = arith.constant 0 : index
    %0 = vector.load %arg1[%c0, %c0_0] : memref<4x128xf32, #tpu.memory_space<vmem>>, vector<4x128xf32>
    %c0_1 = arith.constant 0 : index
    %c0_2 = arith.constant 0 : index
    %1 = vector.load %arg3[%c0_1, %c0_2] : memref<16x1xf32, #tpu.memory_space<vmem>>, vector<16x1xf32>
    %c0_3 = arith.constant 0 : index
    %c0_4 = arith.constant 0 : index
    %2 = vector.load %arg5[%c0_3, %c0_4] : memref<2x1xf32, #tpu.memory_space<vmem>>, vector<2x1xf32>
    %c0_5 = arith.constant 0 : index
    %c0_6 = arith.constant 0 : index
    %3 = vector.load %arg2[%c0_5, %c0_6] : memref<16x4xf32, #tpu.memory_space<vmem>>, vector<16x4xf32>
    %cst = arith.constant dense<0.000000e+00> : vector<16x128xf32>
    %4 = tpu.matmul %3, %0, %cst {dimension_numbers = #tpu.dot_dimension_numbers<[1], [0], [0], [1], [0, 0, 1, 1], [], []>} : vector<16x4xf32>, vector<4x128xf32>, vector<16x128xf32> -> vector<16x128xf32>
    %5 = vector.broadcast %1 : vector<16x1xf32> to vector<16x128xf32>
    %6 = arith.addf %4, %5 : vector<16x128xf32>
    %cst_7 = arith.constant 0.000000e+00 : f32
    %7 = vector.broadcast %cst_7 : f32 to vector<16x128xf32>
    %8 = arith.maximumf %6, %7 : vector<16x128xf32>
    %c0_8 = arith.constant 0 : index
    %c0_9 = arith.constant 0 : index
    %9 = vector.load %arg4[%c0_8, %c0_9] : memref<2x16xf32, #tpu.memory_space<vmem>>, vector<2x16xf32>
    %cst_10 = arith.constant dense<0.000000e+00> : vector<2x128xf32>
    %10 = tpu.matmul %9, %8, %cst_10 {dimension_numbers = #tpu.dot_dimension_numbers<[1], [0], [0], [1], [0, 0, 1, 1], [], []>} : vector<2x16xf32>, vector<16x128xf32>, vector<2x128xf32> -> vector<2x128xf32>
    %11 = vector.broadcast %2 : vector<2x1xf32> to vector<2x128xf32>
    %12 = arith.addf %10, %11 : vector<2x128xf32>
    %13 = vector.extract_strided_slice %12 {offsets = [0, 0], sizes = [1, 128], strides = [1, 1]} : vector<2x128xf32> to vector<1x128xf32>
    %14 = vector.extract_strided_slice %12 {offsets = [1, 0], sizes = [1, 128], strides = [1, 1]} : vector<2x128xf32> to vector<1x128xf32>
    %15 = arith.subf %13, %14 : vector<1x128xf32>
    %cst_11 = arith.constant 0.000000e+00 : f32
    %16 = vector.broadcast %cst_11 : f32 to vector<1x128xf32>
    %17 = arith.subf %16, %15 : vector<1x128xf32>
    %18 = math.exp %17 : vector<1x128xf32>
    %cst_12 = arith.constant 1.000000e+00 : f32
    %19 = vector.broadcast %cst_12 : f32 to vector<1x128xf32>
    %20 = arith.addf %19, %18 : vector<1x128xf32>
    %21 = tpu.reciprocal %20 {approx = true} : vector<1x128xf32> -> vector<1x128xf32>
    %c0_13 = arith.constant 0 : index
    %c0_14 = arith.constant 0 : index
    %22 = vector.load %arg6[%c0_13, %c0_14] : memref<2x128xf32, #tpu.memory_space<vmem>>, vector<1x128xf32>
    tpu.vector_store %arg6[%c0_13, %c0_14], %21 {strides = array<i32>} : memref<2x128xf32, #tpu.memory_space<vmem>>, vector<1x128xf32>,
    %cst_15 = arith.constant 1.000000e+00 : f32
    %23 = vector.broadcast %cst_15 : f32 to vector<1x128xf32>
    %24 = arith.subf %23, %21 : vector<1x128xf32>
    %c1 = arith.constant 1 : index
    %c0_16 = arith.constant 0 : index
    %25 = vector.load %arg6[%c1, %c0_16] : memref<2x128xf32, #tpu.memory_space<vmem>>, vector<1x128xf32>
    tpu.vector_store %arg6[%c1, %c0_16], %24 {strides = array<i32>} : memref<2x128xf32, #tpu.memory_space<vmem>>, vector<1x128xf32>,
    return
  }
  func.func @transform_0(%arg0: i32) -> (i32, i32) {
    %c0_i32 = arith.constant 0 : i32
    %c0_i32_0 = arith.constant 0 : i32
    return %c0_i32, %arg0 : i32, i32
  }
  func.func @transform_1(%arg0: i32) -> (i32, i32) {
    %c0_i32 = arith.constant 0 : i32
    %c0_i32_0 = arith.constant 0 : i32
    %c0_i32_1 = arith.constant 0 : i32
    return %c0_i32, %c0_i32_0 : i32, i32
  }
  func.func @transform_2(%arg0: i32) -> (i32, i32) {
    %c0_i32 = arith.constant 0 : i32
    %c0_i32_0 = arith.constant 0 : i32
    %c0_i32_1 = arith.constant 0 : i32
    return %c0_i32, %c0_i32_0 : i32, i32
  }
  func.func @transform_3(%arg0: i32) -> (i32, i32) {
    %c0_i32 = arith.constant 0 : i32
    %c0_i32_0 = arith.constant 0 : i32
    %c0_i32_1 = arith.constant 0 : i32
    return %c0_i32, %c0_i32_0 : i32, i32
  }
  func.func @transform_4(%arg0: i32) -> (i32, i32) {
    %c0_i32 = arith.constant 0 : i32
    %c0_i32_0 = arith.constant 0 : i32
    %c0_i32_1 = arith.constant 0 : i32
    return %c0_i32, %c0_i32_0 : i32, i32
  }
  func.func @transform_5(%arg0: i32) -> (i32, i32) {
    %c0_i32 = arith.constant 0 : i32
    %c0_i32_0 = arith.constant 0 : i32
    return %c0_i32, %arg0 : i32, i32
  }
}

</mosaic_0001>

<bundles_post_ra>
// kernel: actor_forward.1
= control target key start
LH: loop header
LB: loop body
LE: loop exit
PB: predicated region body
PF: predicated region fallthrough
CT: control target
= control target key end

     0   :  { %vm43_vm0 = vcmask 1043456   ;;  %vm36_vm1 = vcmask 31744   ;;  %v255_v3 = vmov 0   ;;  %v256_v6 = vmov 0.0|0.0   ;;  %s316_s0 = inlined_call_operand.vmem [shape: f32[4,128], index: 0, kind: input, shape index: {}]   ;;  %s317_s1 = inlined_call_operand.vmem [shape: f32[16,4], index: 1, kind: input, shape index: {}]   ;;  %s318_s2 = inlined_call_operand.vmem [shape: f32[16,1], index: 2, kind: input, shape index: {}]   ;;  %s319_s4 = inlined_call_operand.vmem [shape: f32[2,1], index: 4, kind: input, shape index: {}]   ;;  %s320_s3 = inlined_call_operand.vmem [shape: f32[2,16], index: 3, kind: input, shape index: {}]   ;;  %s321_s5 = inlined_call_operand.vmem [shape: f32[2,128], index: 5, kind: output, shape index: {}]  }
   0x1   :  { %v20_v0 = vld [vmem:[%s316_s0] sm:$0xf]  ;;  %v25_v2 = vld [vmem:[%s317_s1 + $0x8] sm:$0xff]  ;;  %249 = vset.pattern.permute.xlu0 %v255_v3  ;;  %250 = vset.pattern.permute.xlu1 %v255_v3  ;;  %vm257_vm2 = vmmov 0   ;;  %v258_v7 = vmov 0.0   ;;  %vm130_vm3 = vcmask 130048  }
   0x2   :  { %v24_v1 = vld [vmem:[%s317_s1] sm:$0xff]  ;;  %230 = vmatprep.subr.msk.mxu0 %vm43_vm0, %v20_v0  ;;  %v22_v5 = vld [vmem:[%s318_s2 + $0x8] sm:$0xff]  ;;  %242 = vmatprep.subr.bf16.mxu1 %v256_v6 }
   0x3   :  { %232 = vmatprep.mubr.msk.f32.mxu0 %vm36_vm1, %v24_v1  ;;  %v21_v4 = vld [vmem:[%s318_s2] sm:$0xff]  ;;  %231 = vmatpush3.msk.msra.mxu0 %vm43_vm0, %v20_v0 }
   0x4   :  { %28 = vperm.xlu0 %249, %v21_v4   ;;  %233 = vmatmul.mubr.msk.f32.vlgmr.msra.gmra.mrb[0].mxu0 %vm36_vm1, %v25_v2  ;;  %v23_v8 = vld [vmem:[%s319_s4] sm:$0x3] }
   0x5   :  { %239 = vmatprep.mubr.msk.f32.mxu1 %vm257_vm2, %v258_v7  ;;  %127 = vperm.xlu1 %250, %v23_v8   ;;  %v124_v18 = vld [vmem:[%s320_s3] sm:$0x3] }
   0x8   :  { %33 = vperm.xlu0 %249, %v22_v5  }
  0x83   :  { %v29_v9 = vpop.permute.xlu0 %28 }
  0x84   :  { %v128_v19 = vpop.permute.xlu1 %127 }
  0x87   :  { %v34_v10 = vpop.permute.xlu0 %33 }
  0xd7   :  { %v234_v11 = vpop.f32.mrb[0].mxu0 }
  0xd8   :  { %v119_v12 = vadd.f32 %v234_v11, %v34_v10  ;;  %v113_v13 = vpop.f32.mrb[1].mxu0 }
  0xd9   :  { %v114_v14 = vadd.f32 %v113_v13, %v29_v9 }
  0xda   :  { %v123_v15 = vmax.f32 %v119_v12, 0.0 }
  0xdb   :  { %v122_v16 = vmax.f32 %v114_v14, 0.0 }
  0xdd   :  { %v243_v17 = vpack.c.bf16 %v123_v15, %v122_v16 }
  0xdf   :  { %244 = vmatpush3.bf16.msra.mxu1 %v243_v17 }
  0xe2   :  { %240 = vmatmul.mubr.msk.f32.vlgmr.msra.gmra.mrb[0].mxu1 %vm130_vm3, %v124_v18 }
 0x1b5   :  { %v200_v20 = vpop.f32.mrb[0].mxu1 }
 0x1b6   :  { %v201_v21 = vadd.f32 %v200_v20, %v128_v19  ;;  %v241_v22 = vpop.f32.mrb[1].mxu1 }
 0x1b8   :  { %v205_v23 = vrot.slane %v201_v21, 1 }
 0x1ba   :  { %v207_v24 = vsub.f32 %v201_v21, %v205_v23 }
 0x1bc   :  { %v208_v25 = vsub.f32 0.0, %v207_v24 }
 0x1be   :  { %v209_v26 = vmul.f32 1.442695, %v208_v25 }
 0x1c0   :  { %251 = vpow2.f32 %v209_v26 }
 0x1ca   :  { %v252_v27 = vpop.eup %251 }
 0x1cb   :  { %v211_v28 = vadd.f32 1.0, %v252_v27 }
 0x1cd   :  { %253 = vrcp.f32 %v211_v28 }
 0x1d7   :  { %v254_v29 = vpop.eup %253 }
 0x1d8   :  { %213 = vst [vmem:[%s321_s5] sm:$0x1] %v254_v29  ;;  %v214_v30 = vsub.f32 1.0, %v254_v29 }
 0x1da   :  { %215 = vst [vmem:[%s321_s5 + $0x1] sm:$0x1] %v214_v30 }

</bundles_post_ra>
